<compile_context>
chip_gen: v7x
topology: tpu7x:2x2x1
jax: 0.10.0
libtpu: 0.0.40
codegen_flags: <defaults>
</compile_context>

<pallas_src>
import functools

import jax
import jax.numpy as jnp
from jax.experimental import pallas as pl
from jax.experimental.pallas import tpu as pltpu


def _round_up(x, m):
    return (x + m - 1) // m * m


def _maybe_pad(a, target_shape):
    """Pad `a` up to target_shape; no-op (no HBM copy) when already that shape."""
    if tuple(a.shape) == tuple(target_shape):
        return a
    return jnp.pad(a, tuple((0, t - s) for s, t in zip(a.shape, target_shape)))


def _vmem_budget_bytes():
    """Generation-aware VMEM budget: ~85% of physical, never the full capacity.

    v5e/v6e (128 MiB physical) -> ~108 MiB; v7x (64 MiB per TC) -> ~54 MiB, leaving
    headroom for compiler-internal scratch / semaphores.
    """
    cap = 64 * 1024 * 1024  # conservative fallback (v7x-class)
    try:
        cap = int(pltpu.get_tpu_info().vmem_capacity_bytes)
    except Exception:
        pass
    return max(32 * 1024 * 1024, int(cap * 0.85))


def _select_tiles(M, hidden_p, pf, x_bytes, w_bytes, out_bytes, acc_bytes, budget):
    """Pick (tm, tpf) filling the VMEM budget to minimize W1/W2 HBM re-streaming."""
    # pf chunk: lane-dense multiple of 128; larger when VMEM is plentiful (fewer k steps).
    tpf = min(1024 if budget >= 96 * 1024 * 1024 else 512, _round_up(pf, 128))
    pf_p = _round_up(pf, tpf)

    # Per-step VMEM cost model (BlockSpec double-buffers every operand):
    weight_bytes = 2 * (hidden_p * tpf + tpf * hidden_p) * w_bytes       # W1 + W2 chunks x2
    weight_bytes += 2 * (tpf + hidden_p) * w_bytes                       # b1 + b2 x2
    per_row_bytes = hidden_p * (2 * x_bytes + 2 * out_bytes + acc_bytes)  # x/out tiles (+acc)

    avail = budget - weight_bytes
    tm = 256 if avail <= 0 else max(256, int(avail // per_row_bytes) // 8 * 8)
    tm = int(min(tm, 4096))            # diminishing returns; keep DMA chunks sane
    tm = min(tm, _round_up(M, 8))

    # Dual-TC parts (v7x): keep >= 2 blocks on the "parallel" row axis when there is
    # enough work, so both TensorCores get fed.
    if M > 512 and M <= tm:
        tm = _round_up(-(-M // 2), 8)

    return tm, tpf, pf_p


def _ffn_kernel_acc(x_ref, w1_ref, b1_ref, w2_ref, b2_ref, o_ref, acc_ref, *, precision):
    """f32 scratch accumulation; used when the output dtype is narrower than f32."""
    k = pl.program_id(1)

    @pl.when(k == 0)
    def _():
        acc_ref[...] = jnp.zeros_like(acc_ref)

    h = jnp.dot(x_ref[...], w1_ref[...],
                preferred_element_type=jnp.float32, precision=precision)
    h = jnp.maximum(h + b1_ref[...], 0.0)
    # Dropout: identity (eval/inference mode).
    # TODO(synk): training-mode dropout (pltpu.prng_seed + stateful_bernoulli) not emitted.
    acc_ref[...] += jnp.dot(h.astype(w2_ref.dtype), w2_ref[...],
                            preferred_element_type=jnp.float32, precision=precision)

    @pl.when(k == pl.num_programs(1) - 1)
    def _():
        # b2 added exactly once; single lane-dense store of the output tile.
        o_ref[...] = (acc_ref[...] + b2_ref[...]).astype(o_ref.dtype)


def _ffn_kernel_inplace(x_ref, w1_ref, b1_ref, w2_ref, b2_ref, o_ref, *, precision):
    """f32 output: accumulate directly into the resident output block (no scratch)."""
    k = pl.program_id(1)

    @pl.when(k == 0)
    def _():
        o_ref[...] = jnp.zeros_like(o_ref)

    h = jnp.dot(x_ref[...], w1_ref[...],
                preferred_element_type=jnp.float32, precision=precision)
    h = jnp.maximum(h + b1_ref[...], 0.0)
    # Dropout: identity (eval/inference mode).
    o_ref[...] += jnp.dot(h.astype(w2_ref.dtype), w2_ref[...],
                          preferred_element_type=jnp.float32, precision=precision)

    @pl.when(k == pl.num_programs(1) - 1)
    def _():
        o_ref[...] += b2_ref[...].astype(o_ref.dtype)


@functools.partial(jax.jit, static_argnames=("tm", "tpf", "weight_buffers"))
def positionwise_feedforward(x, w1, b1, w2, b2, *, tm=None, tpf=None, weight_buffers=2):
    """x: [batch, seq, hidden]; w1: [hidden, pf]; b1: [pf]; w2: [pf, hidden]; b2: [hidden].

    tm/tpf default to generation-aware sizes derived from the VMEM budget. For
    production, feed bf16 x/w1/w2 (halves weight HBM traffic and VMEM, MXU-native)
    and pre-pad/pre-cast the weights once outside the per-call path.
    """
    batch, seq, hidden = x.shape
    pf = w1.shape[1]
    M = batch * seq

    out_dtype = x.dtype
    x_bytes = jnp.dtype(x.dtype).itemsize
    w_bytes = jnp.dtype(w1.dtype).itemsize
    out_bytes = jnp.dtype(out_dtype).itemsize
    use_inplace_acc = out_dtype == jnp.float32
    acc_bytes = 0 if use_inplace_acc else 4

    hidden_p = _round_up(hidden, 128)
    budget = _vmem_budget_bytes()

    tm_auto, tpf_auto, _ = _select_tiles(
        M, hidden_p, pf, x_bytes, w_bytes, out_bytes, acc_bytes, budget)
    tpf = tpf_auto if tpf is None else min(tpf, _round_up(pf, 128))
    tm = tm_auto if tm is None else tm
    tm = min(tm, _round_up(M, 8))
    pf_p = _round_up(pf, tpf)
    M_p = _round_up(M, tm)

    # Lane-dense padding; no-op (no HBM copy) when dims are already aligned.
    x2d = _maybe_pad(x.reshape(M, hidden), (M_p, hidden_p))
    w1p = _maybe_pad(w1, (hidden_p, pf_p))
    b1p = _maybe_pad(b1.reshape(1, pf), (1, pf_p))
    w2p = _maybe_pad(w2, (pf_p, hidden_p))
    b2p = _maybe_pad(b2.reshape(1, hidden), (1, hidden_p))

    grid = (M_p // tm, pf_p // tpf)

    # Optional deeper pipelining for the weight-chunk DMAs (largest transfers).
    w_mode = pl.Buffered(weight_buffers) if weight_buffers > 2 else None

    def _w_spec(shape, idx):
        if w_mode is None:
            return pl.BlockSpec(shape, idx)
        return pl.BlockSpec(shape, idx, pipeline_mode=w_mode)

    in_specs = [
        pl.BlockSpec((tm, hidden_p), lambda i, k: (i, 0)),   # x row tile (resident over k)
        _w_spec((hidden_p, tpf), lambda i, k: (0, k)),       # W1 pf chunk
        pl.BlockSpec((1, tpf), lambda i, k: (0, k)),         # b1 pf chunk
        _w_spec((tpf, hidden_p), lambda i, k: (k, 0)),       # W2 pf chunk
        pl.BlockSpec((1, hidden_p), lambda i, k: (0, 0)),    # b2 (constant)
    ]
    out_spec = pl.BlockSpec((tm, hidden_p), lambda i, k: (i, 0))

    # Exact f32 matmul when inputs are f32 (demo / reference); default MXU path for bf16.
    precision = (jax.lax.Precision.HIGHEST
                 if (x.dtype == jnp.float32 and w1.dtype == jnp.float32) else None)

    if use_inplace_acc:
        kernel = functools.partial(_ffn_kernel_inplace, precision=precision)
        scratch_shapes = []
    else:
        kernel = functools.partial(_ffn_kernel_acc, precision=precision)
        scratch_shapes = [pltpu.VMEM((tm, hidden_p), jnp.float32)]

    out2d = pl.pallas_call(
        kernel,
        out_shape=jax.ShapeDtypeStruct((M_p, hidden_p), out_dtype),
        grid_spec=pltpu.PrefetchScalarGridSpec(
            num_scalar_prefetch=0,
            grid=grid,
            in_specs=in_specs,
            out_specs=out_spec,
            scratch_shapes=scratch_shapes,
        ),
        compiler_params=pltpu.CompilerParams(
            dimension_semantics=("parallel", "arbitrary"),
            vmem_limit_bytes=budget,
        ),
    )(x2d, w1p, b1p, w2p, b2p)

    return out2d[:M, :hidden].reshape(batch, seq, hidden)


def _init_params(key, hidden_dim, pf_dim, dtype=jnp.float32):
    # Deterministic synthetic init matching nn.Linear shapes:
    # fc_1.weight: [pf, hidden], fc_1.bias: [pf]; fc_2.weight: [hidden, pf], fc_2.bias: [hidden]
    k1, k2, k3, k4 = jax.random.split(key, 4)
    bound1 = 1.0 / (hidden_dim ** 0.5)
    bound2 = 1.0 / (pf_dim ** 0.5)
    w1_t = jax.random.uniform(k1, (pf_dim, hidden_dim), dtype, -bound1, bound1)
    b1 = jax.random.uniform(k2, (pf_dim,), dtype, -bound1, bound1)
    w2_t = jax.random.uniform(k3, (hidden_dim, pf_dim), dtype, -bound2, bound2)
    b2 = jax.random.uniform(k4, (hidden_dim,), dtype, -bound2, bound2)
    # Kernel consumes [in, out] layout -> transpose the PyTorch-shaped weights.
    return w1_t.T, b1, w2_t.T, b2


if __name__ == "__main__":
    batch, seq, hidden_dim, pf_dim = 2, 8, 32, 64

    key = jax.random.PRNGKey(0)
    kx, kp = jax.random.split(key)
    x = jax.random.normal(kx, (batch, seq, hidden_dim), jnp.float32)
    w1, b1, w2, b2 = _init_params(kp, hidden_dim, pf_dim)

    out = positionwise_feedforward(x, w1, b1, w2, b2)
    out = jax.block_until_ready(out)

    # Reference check (eval-mode dropout); match the kernel's exact-f32 matmul precision.
    hi = jax.lax.Precision.HIGHEST
    ref_h = jnp.maximum(jnp.einsum("bsh,hp->bsp", x, w1, precision=hi) + b1, 0.0)
    ref = jnp.einsum("bsp,ph->bsh", ref_h, w2, precision=hi) + b2

    assert out.shape == (batch, seq, hidden_dim)
    assert jnp.allclose(out, ref, atol=1e-5, rtol=1e-5)

    print("KERNEL_OK")
</pallas_src>

<mosaic_0001>
module attributes {stable_mosaic.version = 11 : i64} {
  func.func @_ffn_kernel_inplace(%arg0: i32, %arg1: i32, %arg2: memref<16x128xf32, #tpu.memory_space<vmem>>, %arg3: memref<128x128xf32, #tpu.memory_space<vmem>>, %arg4: memref<1x128xf32, #tpu.memory_space<vmem>>, %arg5: memref<128x128xf32, #tpu.memory_space<vmem>>, %arg6: memref<1x128xf32, #tpu.memory_space<vmem>>, %arg7: memref<16x128xf32, #tpu.memory_space<vmem>>) attributes {dimension_semantics = [#tpu.dimension_semantics<parallel>, #tpu.dimension_semantics<arbitrary>], iteration_bounds = array<i64: 1, 1>, scalar_prefetch = 0 : i64, scratch_operands = 0 : i64, tpu.core_type = #tpu.core_type<tc>, window_params = [{transform_indices = @transform_0, window_bounds = array<i64: 16, 128>}, {transform_indices = @transform_1, window_bounds = array<i64: 128, 128>}, {transform_indices = @transform_2, window_bounds = array<i64: 1, 128>}, {transform_indices = @transform_3, window_bounds = array<i64: 128, 128>}, {pipeline_mode = #tpu.pipeline_mode<synchronous>, transform_indices = @transform_4, window_bounds = array<i64: 1, 128>}, {transform_indices = @transform_5, window_bounds = array<i64: 16, 128>}]} {
    %c0_i32 = arith.constant 0 : i32
    %0 = arith.cmpi eq, %arg1, %c0_i32 : i32
    %1 = arith.extui %0 : i1 to i32
    %c0_i32_0 = arith.constant 0 : i32
    %2 = arith.cmpi ne, %1, %c0_i32_0 : i32
    scf.if %2 {
      %cst_16 = arith.constant 0.000000e+00 : f32
      %19 = vector.broadcast %cst_16 : f32 to vector<16x128xf32>
      %c0_17 = arith.constant 0 : index
      %c0_18 = arith.constant 0 : index
      %20 = vector.load %arg7[%c0_17, %c0_18] : memref<16x128xf32, #tpu.memory_space<vmem>>, vector<16x128xf32>
      tpu.vector_store %arg7[%c0_17, %c0_18], %19 {strides = array<i32>} : memref<16x128xf32, #tpu.memory_space<vmem>>, vector<16x128xf32>,
    } else {
    }
    %c0 = arith.constant 0 : index
    %c0_1 = arith.constant 0 : index
    %3 = vector.load %arg2[%c0, %c0_1] : memref<16x128xf32, #tpu.memory_space<vmem>>, vector<16x128xf32>
    %c0_2 = arith.constant 0 : index
    %c0_3 = arith.constant 0 : index
    %4 = vector.load %arg3[%c0_2, %c0_3] : memref<128x128xf32, #tpu.memory_space<vmem>>, vector<128x128xf32>
    %cst = arith.constant dense<0.000000e+00> : vector<16x128xf32>
    %5 = tpu.matmul %3, %4, %cst {dimension_numbers = #tpu.dot_dimension_numbers<[1], [0], [0], [1], [0, 0, 1, 1], [], []>, precision = #tpu.contract_precision<fp32>} : vector<16x128xf32>, vector<128x128xf32>, vector<16x128xf32> -> vector<16x128xf32>
    %c0_4 = arith.constant 0 : index
    %c0_5 = arith.constant 0 : index
    %6 = vector.load %arg4[%c0_4, %c0_5] : memref<1x128xf32, #tpu.memory_space<vmem>>, vector<1x128xf32>
    %7 = vector.broadcast %6 : vector<1x128xf32> to vector<16x128xf32>
    %8 = arith.addf %5, %7 : vector<16x128xf32>
    %cst_6 = arith.constant 0.000000e+00 : f32
    %9 = vector.broadcast %cst_6 : f32 to vector<16x128xf32>
    %10 = arith.maximumf %8, %9 : vector<16x128xf32>
    %c0_7 = arith.constant 0 : index
    %c0_8 = arith.constant 0 : index
    %11 = vector.load %arg7[%c0_7, %c0_8] : memref<16x128xf32, #tpu.memory_space<vmem>>, vector<16x128xf32>
    %c0_9 = arith.constant 0 : index
    %c0_10 = arith.constant 0 : index
    %12 = vector.load %arg5[%c0_9, %c0_10] : memref<128x128xf32, #tpu.memory_space<vmem>>, vector<128x128xf32>
    %cst_11 = arith.constant dense<0.000000e+00> : vector<16x128xf32>
    %13 = tpu.matmul %10, %12, %cst_11 {dimension_numbers = #tpu.dot_dimension_numbers<[1], [0], [0], [1], [0, 0, 1, 1], [], []>, precision = #tpu.contract_precision<fp32>} : vector<16x128xf32>, vector<128x128xf32>, vector<16x128xf32> -> vector<16x128xf32>
    %14 = arith.addf %11, %13 : vector<16x128xf32>
    %c0_12 = arith.constant 0 : index
    %c0_13 = arith.constant 0 : index
    %15 = vector.load %arg7[%c0_12, %c0_13] : memref<16x128xf32, #tpu.memory_space<vmem>>, vector<16x128xf32>
    tpu.vector_store %arg7[%c0_12, %c0_13], %14 {strides = array<i32>} : memref<16x128xf32, #tpu.memory_space<vmem>>, vector<16x128xf32>,
    %c0_i32_14 = arith.constant 0 : i32
    %16 = arith.cmpi eq, %arg1, %c0_i32_14 : i32
    %17 = arith.extui %16 : i1 to i32
    %c0_i32_15 = arith.constant 0 : i32
    %18 = arith.cmpi ne, %17, %c0_i32_15 : i32
    scf.if %18 {
      %c0_16 = arith.constant 0 : index
      %c0_17 = arith.constant 0 : index
      %19 = vector.load %arg7[%c0_16, %c0_17] : memref<16x128xf32, #tpu.memory_space<vmem>>, vector<16x128xf32>
      %c0_18 = arith.constant 0 : index
      %c0_19 = arith.constant 0 : index
      %20 = vector.load %arg6[%c0_18, %c0_19] : memref<1x128xf32, #tpu.memory_space<vmem>>, vector<1x128xf32>
      %21 = vector.broadcast %20 : vector<1x128xf32> to vector<16x128xf32>
      %22 = arith.addf %19, %21 : vector<16x128xf32>
      %c0_20 = arith.constant 0 : index
      %c0_21 = arith.constant 0 : index
      %23 = vector.load %arg7[%c0_20, %c0_21] : memref<16x128xf32, #tpu.memory_space<vmem>>, vector<16x128xf32>
      tpu.vector_store %arg7[%c0_20, %c0_21], %22 {strides = array<i32>} : memref<16x128xf32, #tpu.memory_space<vmem>>, vector<16x128xf32>,
    } else {
    }
    return
  }
  func.func @transform_0(%arg0: i32, %arg1: i32) -> (i32, i32) {
    %c0_i32 = arith.constant 0 : i32
    %c0_i32_0 = arith.constant 0 : i32
    return %arg0, %c0_i32 : i32, i32
  }
  func.func @transform_1(%arg0: i32, %arg1: i32) -> (i32, i32) {
    %c0_i32 = arith.constant 0 : i32
    %c0_i32_0 = arith.constant 0 : i32
    return %c0_i32, %arg1 : i32, i32
  }
  func.func @transform_2(%arg0: i32, %arg1: i32) -> (i32, i32) {
    %c0_i32 = arith.constant 0 : i32
    %c0_i32_0 = arith.constant 0 : i32
    return %c0_i32, %arg1 : i32, i32
  }
  func.func @transform_3(%arg0: i32, %arg1: i32) -> (i32, i32) {
    %c0_i32 = arith.constant 0 : i32
    %c0_i32_0 = arith.constant 0 : i32
    return %arg1, %c0_i32 : i32, i32
  }
  func.func @transform_4(%arg0: i32, %arg1: i32) -> (i32, i32) {
    %c0_i32 = arith.constant 0 : i32
    %c0_i32_0 = arith.constant 0 : i32
    %c0_i32_1 = arith.constant 0 : i32
    return %c0_i32, %c0_i32_0 : i32, i32
  }
  func.func @transform_5(%arg0: i32, %arg1: i32) -> (i32, i32) {
    %c0_i32 = arith.constant 0 : i32
    %c0_i32_0 = arith.constant 0 : i32
    return %arg0, %c0_i32 : i32, i32
  }
}

</mosaic_0001>

<bundles_post_ra>
// kernel: positionwise_feedforward.1
= control target key start
LH: loop header
LB: loop body
LE: loop exit
PB: predicated region body
PF: predicated region fallthrough
CT: control target
= control target key end

     0   :  { %s3204_s1 = inlined_call_operand.vmem [shape: f32[128,128], index: 1, kind: input, shape index: {}]   ;;  %s3205_s0 = inlined_call_operand.vmem [shape: f32[16,128], index: 0, kind: input, shape index: {}]   ;;  %s3206_s3 = inlined_call_operand.vmem [shape: f32[128,128], index: 3, kind: input, shape index: {}]   ;;  %s3207_s2 = inlined_call_operand.vmem [shape: f32[1,128], index: 2, kind: input, shape index: {}]   ;;  %s3208_s4 = inlined_call_operand.vmem [shape: f32[1,128], index: 4, kind: input, shape index: {}]   ;;  %s3209_s5 = inlined_call_operand.vmem [shape: f32[16,128], index: 5, kind: output, shape index: {}]  }
   0x1   :  { %v28_v0 = vld [vmem:[%s3204_s1] sm:$0xff]  ;;  %v29_v1 = vld [vmem:[%s3204_s1 + $0x8] sm:$0xff]  ;;  %v30_v2 = vld [vmem:[%s3204_s1 + $0x10] sm:$0xff] }
   0x2   :  { %v52_v3 = vand.u32 4294901760, %v28_v0  ;;  %v55_v4 = vand.u32 4294901760, %v29_v1  ;;  %v31_v5 = vld [vmem:[%s3204_s1 + $0x18] sm:$0xff]  ;;  %v58_v6 = vand.u32 4294901760, %v30_v2  ;;  %v32_v7 = vld [vmem:[%s3204_s1 + $0x20] sm:$0xff]  ;;  %v33_v8 = vld [vmem:[%s3204_s1 + $0x28] sm:$0xff] }
   0x3   :  { %v61_v9 = vand.u32 4294901760, %v31_v5  ;;  %v64_v11 = vand.u32 4294901760, %v32_v7  ;;  %v67_v12 = vand.u32 4294901760, %v33_v8  ;;  %v2563_v14 = vld [vmem:[%s3204_s1 + $0x30] sm:$0xff]  ;;  %v2568_v15 = vld [vmem:[%s3204_s1 + $0x38] sm:$0xff]  ;;  %v26_v16 = vld [vmem:[%s3205_s0] sm:$0xff] }
   0x4   :  { %v2556_v10 = vpack.c.bf16 %v55_v4, %v52_v3  ;;  %v2575_v17 = vand.u32 4294901760, %v26_v16  ;;  %v70_v19 = vand.u32 4294901760, %v2563_v14  ;;  %v73_v20 = vand.u32 4294901760, %v2568_v15  ;;  %v36_v21 = vld [vmem:[%s3204_s1 + $0x40] sm:$0xff]  ;;  %v37_v22 = vld [vmem:[%s3204_s1 + $0x48] sm:$0xff]  ;;  %v38_v30 = vld [vmem:[%s3204_s1 + $0x50] sm:$0xff] }
   0x5   :  { %v2558_v13 = vpack.c.bf16 %v61_v9, %v58_v6  ;;  %v2578_v18 = vpack.c.bf16 %v67_v12, %v64_v11  ;;  %v27_v24 = vld [vmem:[%s3205_s0 + $0x8] sm:$0xff]  ;;  %v2596_v26 = vsub.f32 %v28_v0, %v52_v3  ;;  %v76_v28 = vand.u32 4294901760, %v36_v21  ;;  %v39_v31 = vld [vmem:[%s3204_s1 + $0x58] sm:$0xff]  ;;  %v40_v33 = vld [vmem:[%s3204_s1 + $0x60] sm:$0xff] }
   0x6   :  { %2102 = vmatprep.subr.bf16.mxu0 %v2556_v10  ;;  %v2589_v23 = vsub.f32 %v26_v16, %v2575_v17  ;;  %v2599_v27 = vpack.c.bf16 %v73_v20, %v70_v19  ;;  %v79_v29 = vand.u32 4294901760, %v37_v22  ;;  %v41_v34 = vld [vmem:[%s3204_s1 + $0x68] sm:$0xff]  ;;  %v42_v35 = vld [vmem:[%s3204_s1 + $0x70] sm:$0xff]  ;;  %v2619_v36 = vand.u32 4294901760, %v27_v24  ;;  %v43_v37 = vld [vmem:[%s3204_s1 + $0x78] sm:$0xff] }
   0x7   :  { %2104 = vmatpush3.bf16.msra.mxu0 %v2556_v10  ;;  %v155_v39 = vand.u32 4294901760, %v2596_v26  ;;  %v2626_v40 = vsub.f32 %v29_v1, %v55_v4  ;;  %v2628_v41 = vsub.f32 %v30_v2, %v58_v6  ;;  %v82_v43 = vand.u32 4294901760, %v38_v30 }
   0x8   :  { %2106 = vmatprep.subr.bf16.mxu0 %v2558_v13  ;;  %v134_v25 = vand.u32 4294901760, %v2589_v23  ;;  %v2631_v42 = vpack.c.bf16 %v79_v29, %v76_v28  ;;  %v85_v44 = vand.u32 4294901760, %v39_v31  ;;  %v88_v45 = vand.u32 4294901760, %v40_v33 }
   0x9   :  { %v91_v46 = vand.u32 4294901760, %v41_v34  ;;  %v94_v47 = vand.u32 4294901760, %v42_v35  ;;  %v97_v48 = vand.u32 4294901760, %v43_v37  ;;  %v2634_v49 = vsub.f32 %v27_v24, %v2619_v36 }
   0xa   :  { %v135_v32 = vsub.f32 %v2589_v23, %v134_v25  ;;  %v2636_v50 = vsub.f32 %v31_v5, %v61_v9  ;;  %v2638_v51 = vsub.f32 %v32_v7, %v64_v11  ;;  %v156_v52 = vsub.f32 %v2596_v26, %v155_v39 }
   0xb   :  { %2108 = vmatpush3.bf16.msra.mxu0 %v2558_v13  ;;  %v162_v53 = vand.u32 4294901760, %v2626_v40  ;;  %v169_v54 = vand.u32 4294901760, %v2628_v41  ;;  %v2644_v55 = vsub.f32 %v33_v8, %v67_v12  ;;  %v2647_v56 = vpack.c.bf16 %v85_v44, %v82_v43 }
   0xc   :  { %2110 = vmatprep.subr.bf16.mxu0 %v2578_v18  ;;  %v136_v38 = vand.u32 4294901760, %v135_v32  ;;  %v2649_v57 = vpack.c.bf16 %v91_v46, %v88_v45  ;;  %v2651_v58 = vpack.c.bf16 %v97_v48, %v94_v47  ;;  %v144_v59 = vand.u32 4294901760, %v2634_v49 }
   0xd   :  { %v176_v60 = vand.u32 4294901760, %v2636_v50  ;;  %v183_v61 = vand.u32 4294901760, %v2638_v51  ;;  %v157_v62 = vand.u32 4294901760, %v156_v52  ;;  %v163_v63 = vsub.f32 %v2626_v40, %v162_v53 }
   0xe   :  { %1713 = vmatprep.mubr.f32.mxu0 %v136_v38  ;;  %v170_v0 = vsub.f32 %v2628_v41, %v169_v54  ;;  %v190_v1 = vand.u32 4294901760, %v2644_v55  ;;  %v2662_v2 = vsub.f32 %v2563_v14, %v70_v19  ;;  %v2665_v3 = vsub.f32 %v2568_v15, %v73_v20 }
   0xf   :  { %2112 = vmatpush3.bf16.msra.mxu0 %v2578_v18  ;;  %v2667_v4 = vsub.f32 %v36_v21, %v76_v28  ;;  %v2669_v5 = vsub.f32 %v37_v22, %v79_v29  ;;  %v2671_v6 = vsub.f32 %v38_v30, %v82_v43  ;;  %v2673_v7 = vsub.f32 %v39_v31, %v85_v44 }
  0x10   :  { %2114 = vmatprep.subr.bf16.mxu0 %v2599_v27  ;;  %v2675_v8 = vsub.f32 %v40_v33, %v88_v45  ;;  %v2677_v9 = vsub.f32 %v41_v34, %v91_v46  ;;  %v145_v11 = vsub.f32 %v2634_v49, %v144_v59  ;;  %v177_v12 = vsub.f32 %v2636_v50, %v176_v60 }
  0x11   :  { %v2683_v14 = vsub.f32 %v42_v35, %v94_v47  ;;  %v2685_v15 = vsub.f32 %v43_v37, %v97_v48  ;;  %v164_v16 = vand.u32 4294901760, %v163_v63  ;;  %v171_v19 = vand.u32 4294901760, %v170_v0 }
  0x12   :  { %v184_v20 = vsub.f32 %v2638_v51, %v183_v61  ;;  %v191_v21 = vsub.f32 %v2644_v55, %v190_v1  ;;  %v197_v22 = vand.u32 4294901760, %v2662_v2  ;;  %v204_v24 = vand.u32 4294901760, %v2665_v3 }
  0x13   :  { %2116 = vmatpush3.bf16.msra.mxu0 %v2599_v27  ;;  %v211_v28 = vand.u32 4294901760, %v2667_v4  ;;  %v218_v29 = vand.u32 4294901760, %v2669_v5  ;;  %v225_v30 = vand.u32 4294901760, %v2671_v6  ;;  %v232_v31 = vand.u32 4294901760, %v2673_v7 }
  0x14   :  { %2118 = vmatprep.subr.bf16.mxu0 %v2631_v42  ;;  %v239_v32 = vand.u32 4294901760, %v2675_v8  ;;  %v246_v33 = vand.u32 4294901760, %v2677_v9  ;;  %v253_v34 = vand.u32 4294901760, %v2683_v14  ;;  %v260_v35 = vand.u32 4294901760, %v2685_v15 }
  0x15   :  { %v2701_v37 = vpack.c.bf16 %v162_v53, %v155_v39  ;;  %v2703_v38 = vpack.c.bf16 %v176_v60, %v169_v54  ;;  %v178_v43 = vand.u32 4294901760, %v177_v12  ;;  %v2706_v44 = vpack.c.bf16 %v190_v1, %v183_v61 }
  0x16   :  { %v2708_v45 = vpack.c.bf16 %v204_v24, %v197_v22  ;;  %v2710_v46 = vpack.c.bf16 %v218_v29, %v211_v28  ;;  %v2133_v47 = vpack.c.bf16 %v164_v16, %v157_v62  ;;  %v2713_v48 = vpack.c.bf16 %v232_v31, %v225_v30 }
  0x17   :  { %2120 = vmatpush3.bf16.msra.mxu0 %v2631_v42  ;;  %v2715_v52 = vpack.c.bf16 %v246_v33, %v239_v32  ;;  %v2717_v39 = vpack.c.bf16 %v260_v35, %v253_v34  ;;  %v146_v53 = vand.u32 4294901760, %v145_v11  ;;  %v185_v54 = vand.u32 4294901760, %v184_v20 }
  0x18   :  { %2122 = vmatprep.subr.bf16.mxu0 %v2647_v56  ;;  %v192_v60 = vand.u32 4294901760, %v191_v21  ;;  %v2137_v61 = vpack.c.bf16 %v178_v43, %v171_v19  ;;  %v198_v63 = vsub.f32 %v2662_v2, %v197_v22  ;;  %v205_v0 = vsub.f32 %v2665_v3, %v204_v24 }
  0x19   :  { %v212_v11 = vsub.f32 %v2667_v4, %v211_v28  ;;  %v219_v16 = vsub.f32 %v2669_v5, %v218_v29  ;;  %v226_v20 = vsub.f32 %v2671_v6, %v225_v30  ;;  %v233_v24 = vsub.f32 %v2673_v7, %v232_v31 }
  0x1a   :  { %v2141_v62 = vpack.c.bf16 %v192_v60, %v185_v54  ;;  %v199_v1 = vand.u32 4294901760, %v198_v63  ;;  %v206_v12 = vand.u32 4294901760, %v205_v0  ;;  %v240_v43 = vsub.f32 %v2675_v8, %v239_v32 }
  0x1b   :  { %2124 = vmatpush3.bf16.msra.mxu0 %v2647_v56  ;;  %v213_v21 = vand.u32 4294901760, %v212_v11  ;;  %v220_v22 = vand.u32 4294901760, %v219_v16  ;;  %v234_v54 = vand.u32 4294901760, %v233_v24  ;;  %v247_v28 = vsub.f32 %v2677_v9, %v246_v33  ;;  %v2765_v16 = vld [vmem:[%s3206_s3 + $0x20] sm:$0xff]  ;;  %v2790_v24 = vld [vmem:[%s3206_s3 + $0x30] sm:$0xff] }
  0x1c   :  { %2126 = vmatprep.subr.bf16.mxu0 %v2649_v57  ;;  %v2145_v19 = vpack.c.bf16 %v206_v12, %v199_v1  ;;  %v241_v29 = vand.u32 4294901760, %v240_v43  ;;  %v261_v63 = vsub.f32 %v2685_v15, %v260_v35  ;;  %v2165_v33 = vpack.c.bf16 %v2626_v40, %v2596_v26  ;;  %v2740_v35 = vld [vmem:[%s3206_s3] sm:$0xff]  ;;  %v2745_v1 = vld [vmem:[%s3206_s3 + $0x8] sm:$0xff]  ;;  %v2750_v26 = vld [vmem:[%s3206_s3 + $0x10] sm:$0xff] }
  0x1d   :  { %v248_v30 = vand.u32 4294901760, %v247_v28  ;;  %v2173_v40 = vpack.c.bf16 %v2644_v55, %v2638_v51  ;;  %v2759_v12 = vld [vmem:[%s3206_s3 + $0x18] sm:$0xff]  ;;  %v762_v11 = vand.u32 4294901760, %v2750_v26  ;;  %v2770_v51 = vld [vmem:[%s3206_s3 + $0x28] sm:$0xff] }
  0x1e   :  { %v262_v32 = vand.u32 4294901760, %v261_v63  ;;  %v765_v55 = vand.u32 4294901760, %v2759_v12  ;;  %v2795_v43 = vld [vmem:[%s3206_s3 + $0x38] sm:$0xff] }
  0x1f   :  { %2128 = vmatpush3.bf16.msra.mxu0 %v2649_v57  ;;  %v2157_v31 = vpack.c.bf16 %v248_v30, %v241_v29  ;;  %v777_v28 = vand.u32 4294901760, %v2795_v43  ;;  %v2185_v29 = vpack.c.bf16 %v2673_v7, %v2671_v6 }
  0x20   :  { %2130 = vmatprep.subr.bf16.mxu0 %v2651_v58 }
  0x23   :  { %2132 = vmatpush3.bf16.msra.mxu0 %v2651_v58 }
  0x24   :  { %2134 = vmatprep.subr.bf16.mxu0 %v2133_v47 }
  0x26   :  { %1714 = vmatmul.mubr.f32.vlgmr.msra.gmra.mrb[0].mxu0 %v146_v53  ;;  %v227_v53 = vand.u32 4294901760, %v226_v20 }
  0x27   :  { %2136 = vmatpush3.bf16.msra.mxu0 %v2133_v47  ;;  %1748 = vmatprep.mubr.f32.mxu0 %v2575_v17  ;;  %v2149_v47 = vpack.c.bf16 %v220_v22, %v213_v21  ;;  %v771_v21 = vand.u32 4294901760, %v2770_v51  ;;  %v2785_v22 = vpack.c.bf16 %v765_v55, %v762_v11 }
  0x28   :  { %2138 = vmatprep.subr.bf16.mxu0 %v2137_v61  ;;  %v2153_v60 = vpack.c.bf16 %v234_v54, %v227_v53  ;;  %v774_v54 = vand.u32 4294901760, %v2790_v24 }
  0x2b   :  { %2140 = vmatpush3.bf16.msra.mxu0 %v2137_v61  ;;  %v254_v61 = vsub.f32 %v2683_v14, %v253_v34  ;;  %v2169_v34 = vpack.c.bf16 %v2636_v50, %v2628_v41  ;;  %v756_v41 = vand.u32 4294901760, %v2740_v35  ;;  %v759_v50 = vand.u32 4294901760, %v2745_v1 }
  0x2c   :  { %2142 = vmatprep.subr.bf16.mxu0 %v2141_v62 }
  0x2d   :  { %v255_v0 = vand.u32 4294901760, %v254_v61  ;;  %v2777_v20 = vpack.c.bf16 %v759_v50, %v756_v41  ;;  %v2917_v7 = vsub.f32 %v2740_v35, %v756_v41 }
  0x2f   :  { %2144 = vmatpush3.bf16.msra.mxu0 %v2141_v62  ;;  %v2161_v62 = vpack.c.bf16 %v262_v32, %v255_v0  ;;  %2294 = vmatprep.subr.bf16.mxu1 %v2777_v20 }
  0x30   :  { %2146 = vmatprep.subr.bf16.mxu0 %v2145_v19  ;;  %2296 = vmatpush3.bf16.msra.mxu1 %v2777_v20 }
  0x31   :  { %2298 = vmatprep.subr.bf16.mxu1 %v2785_v22 }
  0x33   :  { %2148 = vmatpush3.bf16.msra.mxu0 %v2145_v19  ;;  %v768_v19 = vand.u32 4294901760, %v2765_v16 }
  0x34   :  { %2150 = vmatprep.subr.bf16.mxu0 %v2149_v47  ;;  %2300 = vmatpush3.bf16.msra.mxu1 %v2785_v22 }
  0x35   :  { %v2806_v53 = vpack.c.bf16 %v771_v21, %v768_v19 }
  0x37   :  { %2152 = vmatpush3.bf16.msra.mxu0 %v2149_v47  ;;  %v2177_v47 = vpack.c.bf16 %v2665_v3, %v2662_v2  ;;  %v2181_v2 = vpack.c.bf16 %v2669_v5, %v2667_v4  ;;  %2302 = vmatprep.subr.bf16.mxu1 %v2806_v53  ;;  %v2818_v3 = vpack.c.bf16 %v777_v28, %v774_v54 }
  0x38   :  { %2154 = vmatprep.subr.bf16.mxu0 %v2153_v60  ;;  %2304 = vmatpush3.bf16.msra.mxu1 %v2806_v53  ;;  %v2189_v4 = vpack.c.bf16 %v2677_v9, %v2675_v8  ;;  %v2193_v5 = vpack.c.bf16 %v2685_v15, %v2683_v14  ;;  %v2922_v8 = vsub.f32 %v2745_v1, %v759_v50  ;;  %v753_v9 = vld [vmem:[%s3206_s3 + $0x70] sm:$0xff]  ;;  %v754_v14 = vld [vmem:[%s3206_s3 + $0x78] sm:$0xff] }
  0x39   :  { %2306 = vmatprep.subr.bf16.mxu1 %v2818_v3  ;;  %v798_v15 = vand.u32 4294901760, %v753_v9 }
  0x3b   :  { %2156 = vmatpush3.bf16.msra.mxu0 %v2153_v60 }
  0x3c   :  { %2158 = vmatprep.subr.bf16.mxu0 %v2157_v31  ;;  %2308 = vmatpush3.bf16.msra.mxu1 %v2818_v3 }
  0x3f   :  { %2160 = vmatpush3.bf16.msra.mxu0 %v2157_v31 }
  0x40   :  { %2162 = vmatprep.subr.bf16.mxu0 %v2161_v62 }
  0x43   :  { %2164 = vmatpush3.bf16.msra.mxu0 %v2161_v62 }
  0x44   :  { %2166 = vmatprep.subr.bf16.mxu0 %v2165_v33 }
  0x46   :  { %1749 = vmatmul.mubr.f32.vlgmr.msra.gmra.mrb[0].mxu0 %v2619_v36 }
  0x47   :  { %2168 = vmatpush3.bf16.msra.mxu0 %v2165_v33  ;;  %1783 = vmatprep.mubr.f32.mxu0 %v2589_v23 }
  0x48   :  { %2170 = vmatprep.subr.bf16.mxu0 %v2169_v34 }
  0x4b   :  { %2172 = vmatpush3.bf16.msra.mxu0 %v2169_v34 }
  0x4c   :  { %2174 = vmatprep.subr.bf16.mxu0 %v2173_v40 }
  0x4f   :  { %2176 = vmatpush3.bf16.msra.mxu0 %v2173_v40 }
  0x50   :  { %2178 = vmatprep.subr.bf16.mxu0 %v2177_v47 }
  0x53   :  { %2180 = vmatpush3.bf16.msra.mxu0 %v2177_v47 }
  0x54   :  { %2182 = vmatprep.subr.bf16.mxu0 %v2181_v2 }
  0x57   :  { %2184 = vmatpush3.bf16.msra.mxu0 %v2181_v2 }
  0x58   :  { %2186 = vmatprep.subr.bf16.mxu0 %v2185_v29 }
  0x5b   :  { %2188 = vmatpush3.bf16.msra.mxu0 %v2185_v29 }
  0x5c   :  { %2190 = vmatprep.subr.bf16.mxu0 %v2189_v4 }
  0x5f   :  { %2192 = vmatpush3.bf16.msra.mxu0 %v2189_v4 }
  0x60   :  { %2194 = vmatprep.subr.bf16.mxu0 %v2193_v5 }
  0x63   :  { %2196 = vmatpush3.bf16.msra.mxu0 %v2193_v5 }
  0x64   :  { %2198 = vmatprep.subr.bf16.mxu0 %v2556_v10 }
  0x66   :  { %1784 = vmatmul.mubr.f32.vlgmr.msra.gmra.mrb[0].mxu0 %v2634_v49 }
  0x67   :  { %2200 = vmatpush3.bf16.msra.mxu0 %v2556_v10  ;;  %1818 = vmatprep.mubr.f32.mxu0 %v134_v25  ;;  %v749_v25 = vld [vmem:[%s3206_s3 + $0x50] sm:$0xff] }
  0x68   :  { %2202 = vmatprep.subr.bf16.mxu0 %v2558_v13 }
  0x6b   :  { %2204 = vmatpush3.bf16.msra.mxu0 %v2558_v13 }
  0x6c   :  { %2206 = vmatprep.subr.bf16.mxu0 %v2578_v18 }
  0x6f   :  { %2208 = vmatpush3.bf16.msra.mxu0 %v2578_v18 }
  0x70   :  { %2210 = vmatprep.subr.bf16.mxu0 %v2599_v27 }
  0x73   :  { %2212 = vmatpush3.bf16.msra.mxu0 %v2599_v27 }
  0x74   :  { %2214 = vmatprep.subr.bf16.mxu0 %v2631_v42 }
  0x77   :  { %2216 = vmatpush3.bf16.msra.mxu0 %v2631_v42 }
  0x78   :  { %2218 = vmatprep.subr.bf16.mxu0 %v2647_v56 }
  0x7b   :  { %2220 = vmatpush3.bf16.msra.mxu0 %v2647_v56 }
  0x7c   :  { %2222 = vmatprep.subr.bf16.mxu0 %v2649_v57 }
  0x7f   :  { %2224 = vmatpush3.bf16.msra.mxu0 %v2649_v57 }
  0x80   :  { %2226 = vmatprep.subr.bf16.mxu0 %v2651_v58 }
  0x83   :  { %2228 = vmatpush3.bf16.msra.mxu0 %v2651_v58 }
  0x84   :  { %2230 = vmatprep.subr.bf16.mxu0 %v2701_v37 }
  0x86   :  { %1819 = vmatmul.mubr.f32.vlgmr.msra.gmra.mrb[0].mxu0 %v144_v59 }
  0x87   :  { %2232 = vmatpush3.bf16.msra.mxu0 %v2701_v37  ;;  %1853 = vmatprep.mubr.f32.mxu0 %v2575_v17  ;;  %v801_v37 = vand.u32 4294901760, %v754_v14 }
  0x88   :  { %2234 = vmatprep.subr.bf16.mxu0 %v2703_v38 }
  0x8b   :  { %2236 = vmatpush3.bf16.msra.mxu0 %v2703_v38  ;;  %v859_v38 = vand.u32 4294901760, %v2917_v7 }
  0x8c   :  { %2238 = vmatprep.subr.bf16.mxu0 %v2706_v44 }
  0x8f   :  { %2240 = vmatpush3.bf16.msra.mxu0 %v2706_v44  ;;  %v866_v44 = vand.u32 4294901760, %v2922_v8 }
  0x90   :  { %2242 = vmatprep.subr.bf16.mxu0 %v2708_v45 }
  0x93   :  { %2244 = vmatpush3.bf16.msra.mxu0 %v2708_v45  ;;  %v2934_v45 = vpack.c.bf16 %v801_v37, %v798_v15 }
  0x94   :  { %2246 = vmatprep.subr.bf16.mxu0 %v2710_v46 }
  0x97   :  { %2248 = vmatpush3.bf16.msra.mxu0 %v2710_v46  ;;  %v860_v46 = vsub.f32 %v2917_v7, %v859_v38 }
  0x98   :  { %2250 = vmatprep.subr.bf16.mxu0 %v2713_v48 }
  0x9b   :  { %2252 = vmatpush3.bf16.msra.mxu0 %v2713_v48  ;;  %v867_v48 = vsub.f32 %v2922_v8, %v866_v44 }
  0x9c   :  { %2254 = vmatprep.subr.bf16.mxu0 %v2715_v52 }
  0x9f   :  { %2256 = vmatpush3.bf16.msra.mxu0 %v2715_v52  ;;  %v861_v52 = vand.u32 4294901760, %v860_v46 }
  0xa0   :  { %2258 = vmatprep.subr.bf16.mxu0 %v2717_v39 }
  0xa3   :  { %2260 = vmatpush3.bf16.msra.mxu0 %v2717_v39  ;;  %v868_v39 = vand.u32 4294901760, %v867_v48  ;;  %v3005_v48 = vpack.c.bf16 %v2922_v8, %v2917_v7 }
  0xa4   :  { %2262 = vmatprep.subr.bf16.mxu0 %v2556_v10 }
  0xa5   :  { %v2944_v60 = vpack.c.bf16 %v868_v39, %v861_v52 }
  0xa6   :  { %1854 = vmatmul.mubr.f32.vlgmr.msra.gmra.mrb[0].mxu0 %v2619_v36 }
  0xa7   :  { %2264 = vmatpush3.bf16.msra.mxu0 %v2556_v10  ;;  %1888 = vmatprep.mubr.f32.mxu0 %v2575_v17  ;;  %v747_v10 = vld [vmem:[%s3206_s3 + $0x40] sm:$0xff] }
  0xa8   :  { %2266 = vmatprep.subr.bf16.mxu0 %v2558_v13  ;;  %v780_v17 = vand.u32 4294901760, %v747_v10 }
  0xaa   :  { %v2947_v30 = vsub.f32 %v747_v10, %v780_v17 }
  0xab   :  { %2268 = vmatpush3.bf16.msra.mxu0 %v2558_v13  ;;  %v748_v13 = vld [vmem:[%s3206_s3 + $0x48] sm:$0xff] }
  0xac   :  { %2270 = vmatprep.subr.bf16.mxu0 %v2578_v18  ;;  %v915_v63 = vand.u32 4294901760, %v2947_v30 }
  0xae   :  { %v916_v0 = vsub.f32 %v2947_v30, %v915_v63 }
  0xaf   :  { %2272 = vmatpush3.bf16.msra.mxu0 %v2578_v18  ;;  %v783_v18 = vand.u32 4294901760, %v748_v13 }
  0xb0   :  { %2274 = vmatprep.subr.bf16.mxu0 %v2599_v27  ;;  %v917_v34 = vand.u32 4294901760, %v916_v0 }
  0xb1   :  { %v2892_v23 = vpack.c.bf16 %v783_v18, %v780_v17  ;;  %v2949_v61 = vsub.f32 %v748_v13, %v783_v18 }
  0xb3   :  { %2276 = vmatpush3.bf16.msra.mxu0 %v2599_v27  ;;  %v750_v27 = vld [vmem:[%s3206_s3 + $0x58] sm:$0xff]  ;;  %2310 = vmatprep.subr.bf16.mxu1 %v2892_v23  ;;  %v922_v31 = vand.u32 4294901760, %v2949_v61  ;;  %v3009_v52 = vpack.c.bf16 %v2949_v61, %v2947_v30 }
  0xb4   :  { %2278 = vmatprep.subr.bf16.mxu0 %v2631_v42  ;;  %2312 = vmatpush3.bf16.msra.mxu1 %v2892_v23 }
  0xb5   :  { %v923_v32 = vsub.f32 %v2949_v61, %v922_v31 }
  0xb7   :  { %2280 = vmatpush3.bf16.msra.mxu0 %v2631_v42  ;;  %v789_v42 = vand.u32 4294901760, %v750_v27  ;;  %v924_v35 = vand.u32 4294901760, %v923_v32 }
  0xb8   :  { %2282 = vmatprep.subr.bf16.mxu0 %v2647_v56 }
  0xb9   :  { %v2961_v33 = vsub.f32 %v750_v27, %v789_v42  ;;  %v2965_v41 = vpack.c.bf16 %v924_v35, %v917_v34  ;;  %v2986_v27 = vsub.f32 %v754_v14, %v801_v37  ;;  %v1463_v34 = vld [vmem:[%s3207_s2] ss:$0 sm:$0xff]  ;;  %v3029_v35 = vsub.f32 %v2750_v26, %v762_v11 }
  0xba   :  { %v3046_v11 = vsub.f32 %v2770_v51, %v771_v21  ;;  %v3066_v21 = vsub.f32 %v2790_v24, %v774_v54 }
  0xbb   :  { %2284 = vmatpush3.bf16.msra.mxu0 %v2647_v56  ;;  %v751_v56 = vld [vmem:[%s3206_s3 + $0x60] sm:$0xff]  ;;  %v3214_v40 = vand.u32 4294901760, %v2961_v33  ;;  %v3219_v61 = vand.u32 4294901760, %v2986_v27 }
  0xbc   :  { %2286 = vmatprep.subr.bf16.mxu0 %v2649_v57  ;;  %v894_v51 = vand.u32 4294901760, %v3046_v11  ;;  %v901_v54 = vand.u32 4294901760, %v3066_v21 }
  0xbd   :  { %v937_v47 = vsub.f32 %v2961_v33, %v3214_v40 }
  0xbf   :  { %2288 = vmatpush3.bf16.msra.mxu0 %v2649_v57  ;;  %v752_v57 = vld [vmem:[%s3206_s3 + $0x68] sm:$0xff]  ;;  %v938_v5 = vand.u32 4294901760, %v937_v47 }
  0xc0   :  { %2290 = vmatprep.subr.bf16.mxu0 %v2651_v58  ;;  %v795_v59 = vand.u32 4294901760, %v752_v57 }
  0xc2   :  { %v2975_v29 = vsub.f32 %v752_v57, %v795_v59  ;;  %v3210_v57 = vand.u32 4294901760, %v2986_v27 }
  0xc3   :  { %2292 = vmatpush3.bf16.msra.mxu0 %v2651_v58  ;;  %v792_v58 = vand.u32 4294901760, %v751_v56 }
  0xc4   :  { %v3212_v13 = vand.u32 4294901760, %v2975_v29 }
  0xc5   :  { %v2912_v6 = vpack.c.bf16 %v795_v59, %v792_v58  ;;  %v2973_v2 = vsub.f32 %v751_v56, %v792_v58 }
  0xc6   :  { %1889 = vmatmul.mubr.f32.vlgmr.msra.gmra.mrb[0].mxu0 %v2619_v36  ;;  %v786_v36 = vand.u32 4294901760, %v749_v25 }
  0xc7   :  { %v3213_v10 = vand.u32 4294901760, %v2973_v2  ;;  %v3017_v0 = vpack.c.bf16 %v2975_v29, %v2973_v2 }
  0xc8   :  { %v2902_v49 = vpack.c.bf16 %v789_v42, %v786_v36  ;;  %v2959_v62 = vsub.f32 %v749_v25, %v786_v36  ;;  %v2984_v25 = vsub.f32 %v753_v9, %v798_v15  ;;  %v951_v36 = vsub.f32 %v2975_v29, %v3212_v13 }
  0xc9   :  { %v944_v18 = vsub.f32 %v2973_v2, %v3213_v10  ;;  %v965_v9 = vsub.f32 %v2986_v27, %v3210_v57  ;;  %v902_v10 = vsub.f32 %v3066_v21, %v901_v54 }
  0xca   :  { %2314 = vmatprep.subr.bf16.mxu1 %v2902_v49  ;;  %v929_v1 = vand.u32 4294901760, %v2959_v62  ;;  %v3211_v56 = vand.u32 4294901760, %v2984_v25  ;;  %v952_v58 = vand.u32 4294901760, %v951_v36  ;;  %v3013_v39 = vpack.c.bf16 %v2961_v33, %v2959_v62 }
  0xcb   :  { %2316 = vmatpush3.bf16.msra.mxu1 %v2902_v49  ;;  %v945_v42 = vand.u32 4294901760, %v944_v18  ;;  %v966_v37 = vand.u32 4294901760, %v965_v9  ;;  %v3021_v32 = vpack.c.bf16 %v2986_v27, %v2984_v25  ;;  %v873_v36 = vand.u32 4294901760, %v3029_v35 }
  0xcc   :  { %2318 = vmatprep.subr.bf16.mxu1 %v2912_v6  ;;  %v930_v50 = vsub.f32 %v2959_v62, %v929_v1  ;;  %v958_v59 = vsub.f32 %v2984_v25, %v3211_v56  ;;  %v3218_v30 = vand.u32 4294901760, %v2984_v25 }
  0xcd   :  { %v2999_v14 = vpack.c.bf16 %v952_v58, %v945_v42  ;;  %v3041_v58 = vsub.f32 %v2765_v16, %v768_v19  ;;  %v874_v9 = vsub.f32 %v3029_v35, %v873_v36 }
  0xce   :  { %v931_v4 = vand.u32 4294901760, %v930_v50  ;;  %v959_v15 = vand.u32 4294901760, %v958_v59  ;;  %v3034_v50 = vsub.f32 %v2759_v12, %v765_v55 }
  0xcf   :  { %2320 = vmatpush3.bf16.msra.mxu1 %v2912_v6  ;;  %v887_v19 = vand.u32 4294901760, %v3041_v58 }
  0xd0   :  { %2322 = vmatprep.subr.bf16.mxu1 %v2934_v45  ;;  %v2979_v17 = vpack.c.bf16 %v938_v5, %v931_v4  ;;  %v3001_v46 = vpack.c.bf16 %v966_v37, %v959_v15  ;;  %v880_v42 = vand.u32 4294901760, %v3034_v50  ;;  %v3071_v37 = vsub.f32 %v2795_v43, %v777_v28 }
  0xd1   :  { %v895_v43 = vsub.f32 %v3046_v11, %v894_v51  ;;  %v2429_v7 = vpack.c.bf16 %v894_v51, %v887_v19 }
  0xd2   :  { %v881_v16 = vsub.f32 %v3034_v50, %v880_v42  ;;  %v908_v28 = vand.u32 4294901760, %v3071_v37 }
  0xd3   :  { %2324 = vmatpush3.bf16.msra.mxu1 %v2934_v45  ;;  %v896_v13 = vand.u32 4294901760, %v895_v43 }
  0xd4   :  { %2326 = vmatprep.subr.bf16.mxu1 %v2944_v60  ;;  %v909_v40 = vsub.f32 %v3071_v37, %v908_v28  ;;  %v2433_v8 = vpack.c.bf16 %v908_v28, %v901_v54 }
 0x199   :  { %v1890_v47 = vpop.f32.mrb[0].mxu0 }
 0x19a   :  { %v2485_v4 = vadd.f32 %v1890_v47, %v1463_v34  ;;  %v725_v5 = vpop.f32.mrb[1].mxu0 }
 0x19b   :  { %v2486_v18 = vadd.f32 %v1463_v34, %v725_v5  ;;  %v875_v5 = vand.u32 4294901760, %v874_v9 }
 0x19c   :  { %v736_v26 = vmax.f32 %v2485_v4, 0.0 }
 0x19d   :  { %v735_v12 = vmax.f32 %v2486_v18, 0.0  ;;  %v882_v18 = vand.u32 4294901760, %v881_v16 }
 0x19e   :  { %v3048_v55 = vand.u32 4294901760, %v736_v26 }
 0x19f   :  { %v3050_v59 = vand.u32 4294901760, %v735_v12  ;;  %v2329_v16 = vpack.c.bf16 %v882_v18, %v875_v5  ;;  %v903_v5 = vand.u32 4294901760, %v902_v10  ;;  %v910_v18 = vand.u32 4294901760, %v909_v40 }
 0x1a0   :  { %v3060_v15 = vsub.f32 %v736_v26, %v3048_v55  ;;  %v888_v26 = vsub.f32 %v3041_v58, %v887_v19  ;;  %v2365_v40 = vpack.c.bf16 %v3046_v11, %v3041_v58  ;;  %v2421_v10 = vpack.c.bf16 %v866_v44, %v859_v38 }
 0x1a1   :  { %v3074_v34 = vsub.f32 %v735_v12, %v3050_v59  ;;  %v2437_v38 = vpack.c.bf16 %v922_v31, %v915_v63  ;;  %v3215_v44 = vand.u32 4294901760, %v2961_v33  ;;  %v2449_v63 = vpack.c.bf16 %v3219_v61, %v3218_v30 }
 0x1a2   :  { %v848_v47 = vand.u32 4294901760, %v3060_v15  ;;  %v889_v57 = vand.u32 4294901760, %v888_v26  ;;  %v2337_v26 = vpack.c.bf16 %v910_v18, %v903_v5 }
 0x1a3   :  { %v838_v4 = vand.u32 4294901760, %v3074_v34 }
 0x1a4   :  { %v849_v24 = vsub.f32 %v3060_v15, %v848_v47 }
 0x1a5   :  { %v839_v12 = vsub.f32 %v3074_v34, %v838_v4 }
 0x1a6   :  { %v850_v56 = vand.u32 4294901760, %v849_v24 }
 0x1a7   :  { %v840_v9 = vand.u32 4294901760, %v839_v12  ;;  %v2333_v12 = vpack.c.bf16 %v896_v13, %v889_v57  ;;  %v2425_v13 = vpack.c.bf16 %v880_v42, %v873_v36  ;;  %v3217_v57 = vand.u32 4294901760, %v2975_v29 }
 0x1a9   :  { %1923 = vmatprep.mubr.f32.mxu1 %v840_v9 }
 0x1aa   :  { %1924 = vmatmul.mubr.f32.vlgmr.msra.gmra.mrb[0].mxu1 %v850_v56  ;;  %v3216_v56 = vand.u32 4294901760, %v2973_v2 }
 0x1ab   :  { %2328 = vmatpush3.bf16.msra.mxu1 %v2944_v60  ;;  %1958 = vmatprep.mubr.f32.mxu1 %v3050_v59  ;;  %v2361_v60 = vpack.c.bf16 %v3034_v50, %v3029_v35 }
 0x1ac   :  { %2330 = vmatprep.subr.bf16.mxu1 %v2329_v16 }
 0x1af   :  { %2332 = vmatpush3.bf16.msra.mxu1 %v2329_v16 }
 0x1b0   :  { %2334 = vmatprep.subr.bf16.mxu1 %v2333_v12 }
 0x1b3   :  { %2336 = vmatpush3.bf16.msra.mxu1 %v2333_v12 }
 0x1b4   :  { %2338 = vmatprep.subr.bf16.mxu1 %v2337_v26 }
 0x1b7   :  { %2340 = vmatpush3.bf16.msra.mxu1 %v2337_v26 }
 0x1b8   :  { %2342 = vmatprep.subr.bf16.mxu1 %v2965_v41 }
 0x1bb   :  { %2344 = vmatpush3.bf16.msra.mxu1 %v2965_v41  ;;  %v2369_v41 = vpack.c.bf16 %v3071_v37, %v3066_v21 }
 0x1bc   :  { %2346 = vmatprep.subr.bf16.mxu1 %v2979_v17 }
 0x1bf   :  { %2348 = vmatpush3.bf16.msra.mxu1 %v2979_v17  ;;  %v2441_v17 = vpack.c.bf16 %v3215_v44, %v929_v1 }
 0x1c0   :  { %2350 = vmatprep.subr.bf16.mxu1 %v2999_v14 }
 0x1c3   :  { %2352 = vmatpush3.bf16.msra.mxu1 %v2999_v14  ;;  %v2445_v14 = vpack.c.bf16 %v3217_v57, %v3216_v56 }
 0x1c4   :  { %2354 = vmatprep.subr.bf16.mxu1 %v3001_v46 }
 0x1c7   :  { %2356 = vmatpush3.bf16.msra.mxu1 %v3001_v46 }
 0x1c8   :  { %2358 = vmatprep.subr.bf16.mxu1 %v3005_v48 }
 0x1ca   :  { %1959 = vmatmul.mubr.f32.vlgmr.msra.gmra.mrb[0].mxu1 %v3048_v55 }
 0x1cb   :  { %2360 = vmatpush3.bf16.msra.mxu1 %v3005_v48  ;;  %1993 = vmatprep.mubr.f32.mxu1 %v3074_v34 }
 0x1cc   :  { %2362 = vmatprep.subr.bf16.mxu1 %v2361_v60 }
 0x1cf   :  { %2364 = vmatpush3.bf16.msra.mxu1 %v2361_v60 }
 0x1d0   :  { %2366 = vmatprep.subr.bf16.mxu1 %v2365_v40 }
 0x1d3   :  { %2368 = vmatpush3.bf16.msra.mxu1 %v2365_v40 }
 0x1d4   :  { %2370 = vmatprep.subr.bf16.mxu1 %v2369_v41 }
 0x1d7   :  { %2372 = vmatpush3.bf16.msra.mxu1 %v2369_v41 }
 0x1d8   :  { %2374 = vmatprep.subr.bf16.mxu1 %v3009_v52 }
 0x1db   :  { %2376 = vmatpush3.bf16.msra.mxu1 %v3009_v52 }
 0x1dc   :  { %2378 = vmatprep.subr.bf16.mxu1 %v3013_v39 }
 0x1df   :  { %2380 = vmatpush3.bf16.msra.mxu1 %v3013_v39 }
 0x1e0   :  { %2382 = vmatprep.subr.bf16.mxu1 %v3017_v0 }
 0x1e3   :  { %2384 = vmatpush3.bf16.msra.mxu1 %v3017_v0 }
 0x1e4   :  { %2386 = vmatprep.subr.bf16.mxu1 %v3021_v32 }
 0x1e7   :  { %2388 = vmatpush3.bf16.msra.mxu1 %v3021_v32 }
 0x1e8   :  { %2390 = vmatprep.subr.bf16.mxu1 %v2777_v20 }
 0x1ea   :  { %1994 = vmatmul.mubr.f32.vlgmr.msra.gmra.mrb[0].mxu1 %v3060_v15 }
 0x1eb   :  { %2392 = vmatpush3.bf16.msra.mxu1 %v2777_v20  ;;  %2028 = vmatprep.mubr.f32.mxu1 %v838_v4 }
 0x1ec   :  { %2394 = vmatprep.subr.bf16.mxu1 %v2785_v22 }
 0x1ef   :  { %2396 = vmatpush3.bf16.msra.mxu1 %v2785_v22 }
 0x1f0   :  { %2398 = vmatprep.subr.bf16.mxu1 %v2806_v53 }
 0x1f3   :  { %2400 = vmatpush3.bf16.msra.mxu1 %v2806_v53 }
 0x1f4   :  { %2402 = vmatprep.subr.bf16.mxu1 %v2818_v3 }
 0x1f7   :  { %2404 = vmatpush3.bf16.msra.mxu1 %v2818_v3 }
 0x1f8   :  { %2406 = vmatprep.subr.bf16.mxu1 %v2892_v23 }
 0x1fb   :  { %2408 = vmatpush3.bf16.msra.mxu1 %v2892_v23 }
 0x1fc   :  { %2410 = vmatprep.subr.bf16.mxu1 %v2902_v49 }
 0x1ff   :  { %2412 = vmatpush3.bf16.msra.mxu1 %v2902_v49 }
 0x200   :  { %2414 = vmatprep.subr.bf16.mxu1 %v2912_v6 }
 0x203   :  { %2416 = vmatpush3.bf16.msra.mxu1 %v2912_v6 }
 0x204   :  { %2418 = vmatprep.subr.bf16.mxu1 %v2934_v45 }
 0x207   :  { %2420 = vmatpush3.bf16.msra.mxu1 %v2934_v45 }
 0x208   :  { %2422 = vmatprep.subr.bf16.mxu1 %v2421_v10 }
 0x20a   :  { %2029 = vmatmul.mubr.f32.vlgmr.msra.gmra.mrb[0].mxu1 %v848_v47 }
 0x20b   :  { %2424 = vmatpush3.bf16.msra.mxu1 %v2421_v10  ;;  %2063 = vmatprep.mubr.f32.mxu1 %v3050_v59 }
 0x20c   :  { %2426 = vmatprep.subr.bf16.mxu1 %v2425_v13 }
 0x20f   :  { %2428 = vmatpush3.bf16.msra.mxu1 %v2425_v13 }
 0x210   :  { %2430 = vmatprep.subr.bf16.mxu1 %v2429_v7 }
 0x213   :  { %2432 = vmatpush3.bf16.msra.mxu1 %v2429_v7 }
 0x214   :  { %2434 = vmatprep.subr.bf16.mxu1 %v2433_v8 }
 0x217   :  { %2436 = vmatpush3.bf16.msra.mxu1 %v2433_v8 }
 0x218   :  { %2438 = vmatprep.subr.bf16.mxu1 %v2437_v38 }
 0x21b   :  { %2440 = vmatpush3.bf16.msra.mxu1 %v2437_v38 }
 0x21c   :  { %2442 = vmatprep.subr.bf16.mxu1 %v2441_v17 }
 0x21f   :  { %2444 = vmatpush3.bf16.msra.mxu1 %v2441_v17 }
 0x220   :  { %2446 = vmatprep.subr.bf16.mxu1 %v2445_v14 }
 0x223   :  { %2448 = vmatpush3.bf16.msra.mxu1 %v2445_v14 }
 0x224   :  { %2450 = vmatprep.subr.bf16.mxu1 %v2449_v63 }
 0x227   :  { %2452 = vmatpush3.bf16.msra.mxu1 %v2449_v63 }
 0x228   :  { %2454 = vmatprep.subr.bf16.mxu1 %v2777_v20 }
 0x22a   :  { %2064 = vmatmul.mubr.f32.vlgmr.msra.gmra.mrb[0].mxu1 %v3048_v55 }
 0x22b   :  { %2456 = vmatpush3.bf16.msra.mxu1 %v2777_v20  ;;  %2098 = vmatprep.mubr.f32.mxu1 %v3050_v59 }
 0x22c   :  { %2458 = vmatprep.subr.bf16.mxu1 %v2785_v22 }
 0x22f   :  { %2460 = vmatpush3.bf16.msra.mxu1 %v2785_v22  ;;  %v1464_v22 = vld [vmem:[%s3208_s4] ss:$0 sm:$0xff] }
 0x230   :  { %2462 = vmatprep.subr.bf16.mxu1 %v2806_v53 }
 0x233   :  { %2464 = vmatpush3.bf16.msra.mxu1 %v2806_v53 }
 0x234   :  { %2466 = vmatprep.subr.bf16.mxu1 %v2818_v3 }
 0x237   :  { %2468 = vmatpush3.bf16.msra.mxu1 %v2818_v3 }
 0x238   :  { %2470 = vmatprep.subr.bf16.mxu1 %v2892_v23 }
 0x23b   :  { %2472 = vmatpush3.bf16.msra.mxu1 %v2892_v23 }
 0x23c   :  { %2474 = vmatprep.subr.bf16.mxu1 %v2902_v49 }
 0x23f   :  { %2476 = vmatpush3.bf16.msra.mxu1 %v2902_v49 }
 0x240   :  { %2478 = vmatprep.subr.bf16.mxu1 %v2912_v6 }
 0x243   :  { %2480 = vmatpush3.bf16.msra.mxu1 %v2912_v6 }
 0x244   :  { %2482 = vmatprep.subr.bf16.mxu1 %v2934_v45 }
 0x247   :  { %2484 = vmatpush3.bf16.msra.mxu1 %v2934_v45 }
 0x24a   :  { %2099 = vmatmul.mubr.f32.vlgmr.msra.gmra.mrb[0].mxu1 %v3048_v55 }
 0x31d   :  { %v2100_v20 = vpop.f32.mrb[0].mxu1 }
 0x31e   :  { %v1429_v53 = vpop.f32.mrb[1].mxu1  ;;  %v1456_v3 = vadd.f32 %v2100_v20, %v1464_v22 }
 0x31f   :  { %v1455_v23 = vadd.f32 %v1464_v22, %v1429_v53 }
 0x320   :  { %1458 = vst [vmem:[%s3209_s5 + $0x8] sm:$0xff] %v1456_v3 }
 0x321   :  { %1457 = vst [vmem:[%s3209_s5] sm:$0xff] %v1455_v23 }

</bundles_post_ra>
